<compile_context>
chip_gen: v7x
topology: tpu7x:2x2x1
jax: 0.10.0
libtpu: 0.0.40
codegen_flags: <defaults>
</compile_context>

<pallas_src>
import functools

import jax
import jax.numpy as jnp
from jax import lax
from jax.experimental import pallas as pl
from jax.experimental.pallas import tpu as pltpu

# Fixed hyper-parameters of the PyTorch module.
OC1, KH1, KW1, STRIDE1 = 16, 8, 8, 4
OC2, KH2, KW2, STRIDE2 = 32, 4, 4, 2

C1P = 32                 # conv1 channels (16) + ones channel, padded to 32 lanes
OC2P = 128               # lane-dense conv2 output width
N_KPOS = KH2 * KW2       # 16 conv2 kernel positions
K2P = N_KPOS * C1P       # 512: layer-2 contraction depth (= 4 x 128)


def _fused_convnet_kernel(p1_ref, w1_ref, w2_ref, o_ref, h_ref, lhs_ref, *,
                          n_kpos, c1p, m2p, offsets):
    """conv1(+bias,ReLU) -> in-VMEM gather -> conv2(+bias,ReLU).

    p1_ref : (h_rows, K1P) bf16  unique conv1 patches in stride-2 parity row
                                 order; column K1 is a constant-1 bias column.
    w1_ref : (K1P, C1P)   bf16   packed conv1 weight; row K1 = [b1, 1, 0...].
    w2_ref : (K2P, OC2P)  bf16   packed conv2 weight, K ordered (kpos, cin);
                                 b2 folded into row OC1 (h's ones channel).
    o_ref  : (M2P, OC2P)  f32    lane-dense padded output rows (n, oh2p, ow2p).
    h_ref  : (h_rows, C1P) f32   scratch: unique conv1 activation (never in HBM).
    lhs_ref: (M2P, K2P)   bf16   scratch: gathered layer-2 LHS.
    """
    # Layer 1: one MXU dot over the UNIQUE patch rows; bias folded; ReLU in f32.
    h = jnp.dot(p1_ref[...], w1_ref[...], preferred_element_type=jnp.float32)
    h_ref[...] = jnp.maximum(h, 0.0)

    # Conv2 "im2col" from VMEM: with parity-ordered rows, kernel position k
    # needs exactly the contiguous window h[offsets[k] : offsets[k]+M2P, :],
    # which becomes the k-th 32-lane column block of the layer-2 LHS.
    for k in range(n_kpos):
        lhs_ref[:, pl.ds(k * c1p, c1p)] = (
            h_ref[pl.ds(offsets[k], m2p), :].astype(lhs_ref.dtype))

    # Layer 2: a single K = n_kpos*C1P = 512 MXU dot (+ folded bias) and ReLU.
    y = jnp.dot(lhs_ref[...], w2_ref[...], preferred_element_type=jnp.float32)
    o_ref[...] = jnp.maximum(y, 0.0)


def pack_params(params):
    """One-time packing of conv weights into MXU-friendly bf16 operands.

    Call this OUTSIDE the per-step hot path (it only depends on the params).
    """
    w1, b1, w2, b2 = params
    C = w1.shape[1]
    K1 = C * KH1 * KW1
    K1P = ((K1 + 1 + 127) // 128) * 128

    # Flatten the conv1 weight with the same patch-extraction op used on x, so
    # the K-axis feature ordering matches by construction.
    w1_flat = lax.conv_general_dilated_patches(
        w1, (KH1, KW1), (STRIDE1, STRIDE1), "VALID").reshape(OC1, K1)
    w1p = jnp.zeros((K1P, C1P), jnp.float32)
    w1p = w1p.at[:K1, :OC1].set(w1_flat.T)
    w1p = w1p.at[K1, :OC1].set(b1)     # conv1 bias via the ones column of p1
    w1p = w1p.at[K1, OC1].set(1.0)     # carries a constant 1 into h[:, OC1]

    # Packed conv2 weight: K ordered (kernel position, in channel), out
    # channels zero-padded to 128 lanes; b2 folded via h's ones channel.
    w2kc = w2.transpose(2, 3, 1, 0).reshape(N_KPOS, OC1, OC2)   # (k, cin, cout)
    w2kc = jnp.pad(w2kc, ((0, 0), (0, C1P - OC1), (0, 0)))      # (k, C1P, cout)
    w2p = jnp.zeros((K2P, OC2P), jnp.float32)
    w2p = w2p.at[:, :OC2].set(w2kc.reshape(K2P, OC2))
    w2p = w2p.at[OC1, :OC2].set(b2)    # k=0 block, ones channel -> + b2
    return w1p.astype(jnp.bfloat16), w2p.astype(jnp.bfloat16)


def simple_conv_net(x, w1p, w2p):
    """Forward pass equivalent to SimpleConvNet.forward (NCHW in / NCHW out)."""
    N, C, H, W = x.shape
    OH1, OW1 = (H - KH1) // STRIDE1 + 1, (W - KW1) // STRIDE1 + 1
    OH2, OW2 = (OH1 - KH2) // STRIDE2 + 1, (OW1 - KW2) // STRIDE2 + 1
    assert OH1 % 2 == 0 and OW1 % 2 == 0, "conv1 grid must split by stride-2 parity"
    H2, W2 = OH1 // 2, OW1 // 2
    K1 = C * KH1 * KW1
    K1P = w1p.shape[0]
    assert K1P >= K1 + 1 and w1p.shape[1] == C1P and w2p.shape == (K2P, OC2P)

    M1 = N * OH1 * OW1                       # unique conv1 rows (128 here)
    GS = N * H2 * W2                         # rows per parity group == M2P (32)
    M2P = GS
    # Static window offsets: parity group picks which 32-row block, (kh//2,kw//2)
    # shifts within it; the window for kernel position k is h[off_k : off_k+GS].
    offsets = tuple(
        (2 * (kh % 2) + (kw % 2)) * GS + (kh // 2) * W2 + (kw // 2)
        for kh in range(KH2) for kw in range(KW2))
    h_rows = -(-(max(offsets) + GS) // 8) * 8   # pad so every window is in-bounds

    # ---- hot path: conv1 patches (unique rows) in stride-2 parity row order.
    p1 = lax.conv_general_dilated_patches(
        x, (KH1, KW1), (STRIDE1, STRIDE1), "VALID")          # (N, K1, OH1, OW1)
    p1 = p1.reshape(N, K1, H2, 2, W2, 2).transpose(3, 5, 0, 2, 4, 1)
    p1 = p1.reshape(M1, K1)
    p1 = jnp.concatenate([p1, jnp.ones((M1, 1), p1.dtype)], axis=1)  # bias col
    p1 = jnp.pad(p1, ((0, h_rows - M1), (0, K1P - K1 - 1))).astype(jnp.bfloat16)

    kernel = functools.partial(_fused_convnet_kernel, n_kpos=N_KPOS, c1p=C1P,
                               m2p=M2P, offsets=offsets)
    out = pl.pallas_call(
        kernel,
        out_shape=jax.ShapeDtypeStruct((M2P, OC2P), jnp.float32),
        in_specs=[pl.BlockSpec(memory_space=pltpu.MemorySpace.VMEM)] * 3,
        out_specs=pl.BlockSpec(memory_space=pltpu.MemorySpace.VMEM),
        scratch_shapes=[pltpu.VMEM((h_rows, C1P), jnp.float32),
                        pltpu.VMEM((M2P, K2P), jnp.bfloat16)],
    )(p1, w1p, w2p)
    # TODO(synk): for large batch/spatial sizes add an M-grid over output rows
    # with dimension_semantics=("parallel",) and tiled BlockSpecs sized for
    # v7x's 64 MiB VMEM (vmem_limit_bytes in pltpu.CompilerParams) so both v7x
    # TensorCores are used and the patch DMA is double-buffered.

    # Rows are (n, oh2, ow2) on the padded H2 x W2 grid; strip pads, go NCHW.
    out = out.reshape(N, H2, W2, OC2P)[:, :OH2, :OW2, :OC2]
    return out.transpose(0, 3, 1, 2)


def init_params(key, input_channels=3):
    """Deterministic parameter init (PyTorch-style uniform fan-in bounds)."""
    k1, k2, k3, k4 = jax.random.split(key, 4)
    fan1 = input_channels * KH1 * KW1
    bound1 = 1.0 / jnp.sqrt(fan1)
    w1 = jax.random.uniform(k1, (OC1, input_channels, KH1, KW1), jnp.float32,
                            -bound1, bound1)
    b1 = jax.random.uniform(k2, (OC1,), jnp.float32, -bound1, bound1)
    fan2 = OC1 * KH2 * KW2
    bound2 = 1.0 / jnp.sqrt(fan2)
    w2 = jax.random.uniform(k3, (OC2, OC1, KH2, KW2), jnp.float32, -bound2, bound2)
    b2 = jax.random.uniform(k4, (OC2,), jnp.float32, -bound2, bound2)
    return (w1, b1, w2, b2)


if __name__ == "__main__":
    key = jax.random.PRNGKey(0)
    kx, kp = jax.random.split(key)

    # N=2, C=3, H=W=36: conv1 -> (2,16,8,8); conv2 -> (2,32,3,3)
    x = jax.random.normal(kx, (2, 3, 36, 36), jnp.float32)
    params = init_params(kp, input_channels=3)

    # Weight packing is hoisted out of the per-call path (runs once).
    w1p, w2p = pack_params(params)

    fwd = jax.jit(simple_conv_net)
    out = jax.block_until_ready(fwd(x, w1p, w2p))

    # Sanity: shape, dtype, ReLU non-negativity.
    assert out.shape == (2, 32, 3, 3), out.shape
    assert out.dtype == jnp.float32
    assert bool(jnp.all(out >= 0.0))

    # Cross-check against a plain-JAX f32 reference conv net (bf16 MXU operands
    # in the kernel -> relaxed tolerance).
    def ref_forward(x, params):
        w1, b1, w2, b2 = params
        h = lax.conv_general_dilated(x, w1, (STRIDE1, STRIDE1), "VALID",
                                     dimension_numbers=("NCHW", "OIHW", "NCHW"))
        h = jnp.maximum(h + b1[None, :, None, None], 0.0)
        y = lax.conv_general_dilated(h, w2, (STRIDE2, STRIDE2), "VALID",
                                     dimension_numbers=("NCHW", "OIHW", "NCHW"))
        return jnp.maximum(y + b2[None, :, None, None], 0.0)

    ref = ref_forward(x, params)
    assert jnp.allclose(out, ref, atol=2e-2, rtol=2e-2), \
        float(jnp.max(jnp.abs(out - ref)))

    print("KERNEL_OK")
</pallas_src>

<mosaic_0001>
module attributes {stable_mosaic.version = 11 : i64} {
  func.func @_fused_convnet_kernel(%arg0: memref<136x256xbf16, #tpu.memory_space<vmem>>, %arg1: memref<256x32xbf16, #tpu.memory_space<vmem>>, %arg2: memref<512x128xbf16, #tpu.memory_space<vmem>>, %arg3: memref<32x128xf32, #tpu.memory_space<vmem>>, %arg4: memref<136x32xf32, #tpu.memory_space<vmem>>, %arg5: memref<32x512xbf16, #tpu.memory_space<vmem>>) attributes {dimension_semantics = [], scalar_prefetch = 0 : i64, scratch_operands = 2 : i64, tpu.core_type = #tpu.core_type<tc>} {
    %c0 = arith.constant 0 : index
    %c0_0 = arith.constant 0 : index
    %0 = vector.load %arg0[%c0, %c0_0] : memref<136x256xbf16, #tpu.memory_space<vmem>>, vector<136x256xbf16>
    %c0_1 = arith.constant 0 : index
    %c0_2 = arith.constant 0 : index
    %1 = vector.load %arg1[%c0_1, %c0_2] : memref<256x32xbf16, #tpu.memory_space<vmem>>, vector<256x32xbf16>
    %cst = arith.constant dense<0.000000e+00> : vector<136x32xf32>
    %2 = tpu.matmul %0, %1, %cst {dimension_numbers = #tpu.dot_dimension_numbers<[1], [0], [0], [1], [0, 0, 1, 1], [], []>} : vector<136x256xbf16>, vector<256x32xbf16>, vector<136x32xf32> -> vector<136x32xf32>
    %cst_3 = arith.constant 0.000000e+00 : f32
    %3 = vector.broadcast %cst_3 : f32 to vector<136x32xf32>
    %4 = arith.maximumf %2, %3 : vector<136x32xf32>
    %c0_4 = arith.constant 0 : index
    %c0_5 = arith.constant 0 : index
    %5 = vector.load %arg4[%c0_4, %c0_5] : memref<136x32xf32, #tpu.memory_space<vmem>>, vector<136x32xf32>
    tpu.vector_store %arg4[%c0_4, %c0_5], %4 {strides = array<i32>} : memref<136x32xf32, #tpu.memory_space<vmem>>, vector<136x32xf32>,
    %c0_6 = arith.constant 0 : index
    %c0_7 = arith.constant 0 : index
    %6 = vector.load %arg4[%c0_6, %c0_7] : memref<136x32xf32, #tpu.memory_space<vmem>>, vector<32x32xf32>
    %7 = arith.truncf %6 : vector<32x32xf32> to vector<32x32xbf16>
    %c0_8 = arith.constant 0 : index
    %c0_9 = arith.constant 0 : index
    %8 = vector.load %arg5[%c0_8, %c0_9] : memref<32x512xbf16, #tpu.memory_space<vmem>>, vector<32x32xbf16>
    tpu.vector_store %arg5[%c0_8, %c0_9], %7 {strides = array<i32>} : memref<32x512xbf16, #tpu.memory_space<vmem>>, vector<32x32xbf16>,
    %c32 = arith.constant 32 : index
    %c0_10 = arith.constant 0 : index
    %9 = vector.load %arg4[%c32, %c0_10] : memref<136x32xf32, #tpu.memory_space<vmem>>, vector<32x32xf32>
    %10 = arith.truncf %9 : vector<32x32xf32> to vector<32x32xbf16>
    %c0_11 = arith.constant 0 : index
    %c32_12 = arith.constant 32 : index
    %11 = vector.load %arg5[%c0_11, %c32_12] : memref<32x512xbf16, #tpu.memory_space<vmem>>, vector<32x32xbf16>
    tpu.vector_store %arg5[%c0_11, %c32_12], %10 {strides = array<i32>} : memref<32x512xbf16, #tpu.memory_space<vmem>>, vector<32x32xbf16>,
    %c1 = arith.constant 1 : index
    %c0_13 = arith.constant 0 : index
    %12 = vector.load %arg4[%c1, %c0_13] : memref<136x32xf32, #tpu.memory_space<vmem>>, vector<32x32xf32>
    %13 = arith.truncf %12 : vector<32x32xf32> to vector<32x32xbf16>
    %c0_14 = arith.constant 0 : index
    %c64 = arith.constant 64 : index
    %14 = vector.load %arg5[%c0_14, %c64] : memref<32x512xbf16, #tpu.memory_space<vmem>>, vector<32x32xbf16>
    tpu.vector_store %arg5[%c0_14, %c64], %13 {strides = array<i32>} : memref<32x512xbf16, #tpu.memory_space<vmem>>, vector<32x32xbf16>,
    %c33 = arith.constant 33 : index
    %c0_15 = arith.constant 0 : index
    %15 = vector.load %arg4[%c33, %c0_15] : memref<136x32xf32, #tpu.memory_space<vmem>>, vector<32x32xf32>
    %16 = arith.truncf %15 : vector<32x32xf32> to vector<32x32xbf16>
    %c0_16 = arith.constant 0 : index
    %c96 = arith.constant 96 : index
    %17 = vector.load %arg5[%c0_16, %c96] : memref<32x512xbf16, #tpu.memory_space<vmem>>, vector<32x32xbf16>
    tpu.vector_store %arg5[%c0_16, %c96], %16 {strides = array<i32>} : memref<32x512xbf16, #tpu.memory_space<vmem>>, vector<32x32xbf16>,
    %c64_17 = arith.constant 64 : index
    %c0_18 = arith.constant 0 : index
    %18 = vector.load %arg4[%c64_17, %c0_18] : memref<136x32xf32, #tpu.memory_space<vmem>>, vector<32x32xf32>
    %19 = arith.truncf %18 : vector<32x32xf32> to vector<32x32xbf16>
    %c0_19 = arith.constant 0 : index
    %c128 = arith.constant 128 : index
    %20 = vector.load %arg5[%c0_19, %c128] : memref<32x512xbf16, #tpu.memory_space<vmem>>, vector<32x32xbf16>
    tpu.vector_store %arg5[%c0_19, %c128], %19 {strides = array<i32>} : memref<32x512xbf16, #tpu.memory_space<vmem>>, vector<32x32xbf16>,
    %c96_20 = arith.constant 96 : index
    %c0_21 = arith.constant 0 : index
    %21 = vector.load %arg4[%c96_20, %c0_21] : memref<136x32xf32, #tpu.memory_space<vmem>>, vector<32x32xf32>
    %22 = arith.truncf %21 : vector<32x32xf32> to vector<32x32xbf16>
    %c0_22 = arith.constant 0 : index
    %c160 = arith.constant 160 : index
    %23 = vector.load %arg5[%c0_22, %c160] : memref<32x512xbf16, #tpu.memory_space<vmem>>, vector<32x32xbf16>
    tpu.vector_store %arg5[%c0_22, %c160], %22 {strides = array<i32>} : memref<32x512xbf16, #tpu.memory_space<vmem>>, vector<32x32xbf16>,
    %c65 = arith.constant 65 : index
    %c0_23 = arith.constant 0 : index
    %24 = vector.load %arg4[%c65, %c0_23] : memref<136x32xf32, #tpu.memory_space<vmem>>, vector<32x32xf32>
    %25 = arith.truncf %24 : vector<32x32xf32> to vector<32x32xbf16>
    %c0_24 = arith.constant 0 : index
    %c192 = arith.constant 192 : index
    %26 = vector.load %arg5[%c0_24, %c192] : memref<32x512xbf16, #tpu.memory_space<vmem>>, vector<32x32xbf16>
    tpu.vector_store %arg5[%c0_24, %c192], %25 {strides = array<i32>} : memref<32x512xbf16, #tpu.memory_space<vmem>>, vector<32x32xbf16>,
    %c97 = arith.constant 97 : index
    %c0_25 = arith.constant 0 : index
    %27 = vector.load %arg4[%c97, %c0_25] : memref<136x32xf32, #tpu.memory_space<vmem>>, vector<32x32xf32>
    %28 = arith.truncf %27 : vector<32x32xf32> to vector<32x32xbf16>
    %c0_26 = arith.constant 0 : index
    %c224 = arith.constant 224 : index
    %29 = vector.load %arg5[%c0_26, %c224] : memref<32x512xbf16, #tpu.memory_space<vmem>>, vector<32x32xbf16>
    tpu.vector_store %arg5[%c0_26, %c224], %28 {strides = array<i32>} : memref<32x512xbf16, #tpu.memory_space<vmem>>, vector<32x32xbf16>,
    %c4 = arith.constant 4 : index
    %c0_27 = arith.constant 0 : index
    %30 = vector.load %arg4[%c4, %c0_27] : memref<136x32xf32, #tpu.memory_space<vmem>>, vector<32x32xf32>
    %31 = arith.truncf %30 : vector<32x32xf32> to vector<32x32xbf16>
    %c0_28 = arith.constant 0 : index
    %c256 = arith.constant 256 : index
    %32 = vector.load %arg5[%c0_28, %c256] : memref<32x512xbf16, #tpu.memory_space<vmem>>, vector<32x32xbf16>
    tpu.vector_store %arg5[%c0_28, %c256], %31 {strides = array<i32>} : memref<32x512xbf16, #tpu.memory_space<vmem>>, vector<32x32xbf16>,
    %c36 = arith.constant 36 : index
    %c0_29 = arith.constant 0 : index
    %33 = vector.load %arg4[%c36, %c0_29] : memref<136x32xf32, #tpu.memory_space<vmem>>, vector<32x32xf32>
    %34 = arith.truncf %33 : vector<32x32xf32> to vector<32x32xbf16>
    %c0_30 = arith.constant 0 : index
    %c288 = arith.constant 288 : index
    %35 = vector.load %arg5[%c0_30, %c288] : memref<32x512xbf16, #tpu.memory_space<vmem>>, vector<32x32xbf16>
    tpu.vector_store %arg5[%c0_30, %c288], %34 {strides = array<i32>} : memref<32x512xbf16, #tpu.memory_space<vmem>>, vector<32x32xbf16>,
    %c5 = arith.constant 5 : index
    %c0_31 = arith.constant 0 : index
    %36 = vector.load %arg4[%c5, %c0_31] : memref<136x32xf32, #tpu.memory_space<vmem>>, vector<32x32xf32>
    %37 = arith.truncf %36 : vector<32x32xf32> to vector<32x32xbf16>
    %c0_32 = arith.constant 0 : index
    %c320 = arith.constant 320 : index
    %38 = vector.load %arg5[%c0_32, %c320] : memref<32x512xbf16, #tpu.memory_space<vmem>>, vector<32x32xbf16>
    tpu.vector_store %arg5[%c0_32, %c320], %37 {strides = array<i32>} : memref<32x512xbf16, #tpu.memory_space<vmem>>, vector<32x32xbf16>,
    %c37 = arith.constant 37 : index
    %c0_33 = arith.constant 0 : index
    %39 = vector.load %arg4[%c37, %c0_33] : memref<136x32xf32, #tpu.memory_space<vmem>>, vector<32x32xf32>
    %40 = arith.truncf %39 : vector<32x32xf32> to vector<32x32xbf16>
    %c0_34 = arith.constant 0 : index
    %c352 = arith.constant 352 : index
    %41 = vector.load %arg5[%c0_34, %c352] : memref<32x512xbf16, #tpu.memory_space<vmem>>, vector<32x32xbf16>
    tpu.vector_store %arg5[%c0_34, %c352], %40 {strides = array<i32>} : memref<32x512xbf16, #tpu.memory_space<vmem>>, vector<32x32xbf16>,
    %c68 = arith.constant 68 : index
    %c0_35 = arith.constant 0 : index
    %42 = vector.load %arg4[%c68, %c0_35] : memref<136x32xf32, #tpu.memory_space<vmem>>, vector<32x32xf32>
    %43 = arith.truncf %42 : vector<32x32xf32> to vector<32x32xbf16>
    %c0_36 = arith.constant 0 : index
    %c384 = arith.constant 384 : index
    %44 = vector.load %arg5[%c0_36, %c384] : memref<32x512xbf16, #tpu.memory_space<vmem>>, vector<32x32xbf16>
    tpu.vector_store %arg5[%c0_36, %c384], %43 {strides = array<i32>} : memref<32x512xbf16, #tpu.memory_space<vmem>>, vector<32x32xbf16>,
    %c100 = arith.constant 100 : index
    %c0_37 = arith.constant 0 : index
    %45 = vector.load %arg4[%c100, %c0_37] : memref<136x32xf32, #tpu.memory_space<vmem>>, vector<32x32xf32>
    %46 = arith.truncf %45 : vector<32x32xf32> to vector<32x32xbf16>
    %c0_38 = arith.constant 0 : index
    %c416 = arith.constant 416 : index
    %47 = vector.load %arg5[%c0_38, %c416] : memref<32x512xbf16, #tpu.memory_space<vmem>>, vector<32x32xbf16>
    tpu.vector_store %arg5[%c0_38, %c416], %46 {strides = array<i32>} : memref<32x512xbf16, #tpu.memory_space<vmem>>, vector<32x32xbf16>,
    %c69 = arith.constant 69 : index
    %c0_39 = arith.constant 0 : index
    %48 = vector.load %arg4[%c69, %c0_39] : memref<136x32xf32, #tpu.memory_space<vmem>>, vector<32x32xf32>
    %49 = arith.truncf %48 : vector<32x32xf32> to vector<32x32xbf16>
    %c0_40 = arith.constant 0 : index
    %c448 = arith.constant 448 : index
    %50 = vector.load %arg5[%c0_40, %c448] : memref<32x512xbf16, #tpu.memory_space<vmem>>, vector<32x32xbf16>
    tpu.vector_store %arg5[%c0_40, %c448], %49 {strides = array<i32>} : memref<32x512xbf16, #tpu.memory_space<vmem>>, vector<32x32xbf16>,
    %c101 = arith.constant 101 : index
    %c0_41 = arith.constant 0 : index
    %51 = vector.load %arg4[%c101, %c0_41] : memref<136x32xf32, #tpu.memory_space<vmem>>, vector<32x32xf32>
    %52 = arith.truncf %51 : vector<32x32xf32> to vector<32x32xbf16>
    %c0_42 = arith.constant 0 : index
    %c480 = arith.constant 480 : index
    %53 = vector.load %arg5[%c0_42, %c480] : memref<32x512xbf16, #tpu.memory_space<vmem>>, vector<32x32xbf16>
    tpu.vector_store %arg5[%c0_42, %c480], %52 {strides = array<i32>} : memref<32x512xbf16, #tpu.memory_space<vmem>>, vector<32x32xbf16>,
    %c0_43 = arith.constant 0 : index
    %c0_44 = arith.constant 0 : index
    %54 = vector.load %arg5[%c0_43, %c0_44] : memref<32x512xbf16, #tpu.memory_space<vmem>>, vector<32x512xbf16>
    %c0_45 = arith.constant 0 : index
    %c0_46 = arith.constant 0 : index
    %55 = vector.load %arg2[%c0_45, %c0_46] : memref<512x128xbf16, #tpu.memory_space<vmem>>, vector<512x128xbf16>
    %cst_47 = arith.constant dense<0.000000e+00> : vector<32x128xf32>
    %56 = tpu.matmul %54, %55, %cst_47 {dimension_numbers = #tpu.dot_dimension_numbers<[1], [0], [0], [1], [0, 0, 1, 1], [], []>} : vector<32x512xbf16>, vector<512x128xbf16>, vector<32x128xf32> -> vector<32x128xf32>
    %cst_48 = arith.constant 0.000000e+00 : f32
    %57 = vector.broadcast %cst_48 : f32 to vector<32x128xf32>
    %58 = arith.maximumf %56, %57 : vector<32x128xf32>
    %c0_49 = arith.constant 0 : index
    %c0_50 = arith.constant 0 : index
    %59 = vector.load %arg3[%c0_49, %c0_50] : memref<32x128xf32, #tpu.memory_space<vmem>>, vector<32x128xf32>
    tpu.vector_store %arg3[%c0_49, %c0_50], %58 {strides = array<i32>} : memref<32x128xf32, #tpu.memory_space<vmem>>, vector<32x128xf32>,
    return
  }
}

</mosaic_0001>

<bundles_post_ra>
// kernel: simple_conv_net.1
= control target key start
LH: loop header
LB: loop body
LE: loop exit
PB: predicated region body
PF: predicated region fallthrough
CT: control target
= control target key end

     0   :  { %vm368_vm0 = vcmask 261120   ;;  %s1256_s24 = smov 64   ;;  %s1257_s30 = smov 32   ;;  %vm408_vm1 = vcmask 523520   ;;  %vm425_vm2 = vcmask 785920   ;;  %vm442_vm3 = vcmask 1048320   ;;  %s1559_s1 = inlined_call_operand.vmem [shape: bf16[256,32], index: 1, kind: input, shape index: {}]   ;;  %s1560_s0 = inlined_call_operand.vmem [shape: bf16[136,256], index: 0, kind: input, shape index: {}]   ;;  %s1561_s2 = inlined_call_operand.vmem [shape: bf16[512,128], index: 2, kind: input, shape index: {}]   ;;  %s1562_s3 = inlined_call_operand.vmem [shape: f32[32,128], index: 3, kind: output, shape index: {}]  }
   0x1   :  { %v1182_v0 = vld [vmem:[%s1559_s1 + $0x40] sm:$0xff]   ;;  %v1184_v2 = vld [vmem:[%s1559_s1 + $0x48] sm:$0xff]   ;;  %v1186_v4 = vld [vmem:[%s1559_s1 + $0x50] sm:$0xff]   ;;  %s1258_s23 = smov 96  }
   0x2   :  { %v1183_v1 = vld [vmem:[%s1559_s1] sm:$0xff]   ;;  %1053 = vmatprep.subr.bf16.mxu0 %v1182_v0  ;;  %v1185_v3 = vld [vmem:[%s1559_s1 + $0x8] sm:$0xff]   ;;  %v1187_v5 = vld [vmem:[%s1559_s1 + $0x10] sm:$0xff]  }
   0x3   :  { %1054 = vmatpush3.bf16.msra.mxu0 %v1183_v1  ;;  %v1188_v6 = vld [vmem:[%s1559_s1 + $0x58] sm:$0xff]   ;;  %v1190_v8 = vld [vmem:[%s1559_s1 + $0x60] sm:$0xff]   ;;  %v1192_v10 = vld [vmem:[%s1559_s1 + $0x68] sm:$0xff]  }
   0x4   :  { %1055 = vmatprep.subr.bf16.mxu0 %v1184_v2  ;;  %v1189_v7 = vld [vmem:[%s1559_s1 + $0x18] sm:$0xff]   ;;  %v1191_v9 = vld [vmem:[%s1559_s1 + $0x20] sm:$0xff]   ;;  %v1193_v12 = vld [vmem:[%s1559_s1 + $0x28] sm:$0xff]  }
   0x5   :  { %v1200_v11 = vld [vmem:[%s1560_s0 + $0x4] ss:$8 sps:$4 sm:$0xff]   ;;  %v1194_v13 = vld [vmem:[%s1559_s1 + $0x70] sm:$0xff]   ;;  %v1196_v15 = vld [vmem:[%s1559_s1 + $0x78] sm:$0xff]  }
   0x6   :  { %279 = vmatprep.mubr.bf16.mxu0 %v1200_v11  ;;  %v1195_v14 = vld [vmem:[%s1559_s1 + $0x30] sm:$0xff]   ;;  %v1197_v16 = vld [vmem:[%s1559_s1 + $0x38] sm:$0xff]   ;;  %v1198_v17 = vld [vmem:[%s1560_s0] ss:$8 sps:$4 sm:$0xff]  }
   0x7   :  { %1056 = vmatpush3.bf16.msra.mxu0 %v1185_v3  ;;  %v1201_v18 = vld [vmem:[%s1560_s0 + $0x14] ss:$8 sps:$4 sm:$0xff]   ;;  %v1203_v19 = vld [vmem:[%s1560_s0 + $0x10] ss:$8 sps:$4 sm:$0xff]   ;;  %v1204_v20 = vld [vmem:[%s1560_s0 + $0x24] ss:$8 sps:$4 sm:$0xff]  }
   0x8   :  { %1057 = vmatprep.subr.bf16.mxu0 %v1186_v4  ;;  %v1206_v21 = vld [vmem:[%s1560_s0 + $0x20] ss:$8 sps:$4 sm:$0xff]   ;;  %v1207_v22 = vld [vmem:[%s1560_s0 + $0x34] ss:$8 sps:$4 sm:$0xff]   ;;  %v1209_v23 = vld [vmem:[%s1560_s0 + $0x30] ss:$8 sps:$4 sm:$0xff]  }
   0x9   :  { %v1210_v24 = vld [vmem:[%s1560_s0 + $0x44] ss:$8 sps:$4 sm:$0xff]   ;;  %v1212_v25 = vld [vmem:[%s1560_s0 + $0x40] ss:$8 sps:$4 sm:$0xff]   ;;  %v1213_v26 = vld [vmem:[%s1560_s0 + $0x54] ss:$8 sps:$4 sm:$0xff]  }
   0xa   :  { %v1215_v27 = vld [vmem:[%s1560_s0 + $0x50] ss:$8 sps:$4 sm:$0xff]   ;;  %v1216_v28 = vld [vmem:[%s1560_s0 + $0x64] ss:$8 sps:$4 sm:$0xff]   ;;  %v1218_v29 = vld [vmem:[%s1560_s0 + $0x60] ss:$8 sps:$4 sm:$0xff]  }
   0xb   :  { %1058 = vmatpush3.bf16.msra.mxu0 %v1187_v5  ;;  %v1219_v30 = vld [vmem:[%s1560_s0 + $0x74] ss:$8 sps:$4 sm:$0xff]   ;;  %v31_v31 = vld [vmem:[%s1560_s0 + $0x80] sm:$0xff]  ;;  %v1221_v32 = vld [vmem:[%s1560_s0 + $0x70] ss:$8 sps:$4 sm:$0xff]  }
   0xc   :  { %1059 = vmatprep.subr.bf16.mxu0 %v1188_v6  ;;  %v1004_v33 = vcombine.high %v31_v31, %v31_v31  ;;  %v1003_v34 = vcombine.low %v31_v31, %v31_v31  ;;  %v1224_v1 = vld [vmem:[%s1561_s2 + $0x40] sm:$0xff]   ;;  %v1226_v5 = vld [vmem:[%s1561_s2 + $0x48] sm:$0xff]  }
   0xd   :  { %1123 = vmatprep.subr.bf16.mxu1 %v1224_v1  ;;  %v1225_v3 = vld [vmem:[%s1561_s2] sm:$0xff]   ;;  %v1234_v1 = vld [vmem:[%s1561_s2 + $0x68] sm:$0xff]  }
   0xe   :  { %1124 = vmatpush3.bf16.msra.mxu1 %v1225_v3 }
   0xf   :  { %1060 = vmatpush3.bf16.msra.mxu0 %v1189_v7  ;;  %1125 = vmatprep.subr.bf16.mxu1 %v1226_v5 }
  0x10   :  { %1061 = vmatprep.subr.bf16.mxu0 %v1190_v8 }
  0x13   :  { %1062 = vmatpush3.bf16.msra.mxu0 %v1191_v9  ;;  %v1227_v9 = vld [vmem:[%s1561_s2 + $0x8] sm:$0xff]  }
  0x14   :  { %1063 = vmatprep.subr.bf16.mxu0 %v1192_v10  ;;  %1126 = vmatpush3.bf16.msra.mxu1 %v1227_v9 }
  0x17   :  { %1064 = vmatpush3.bf16.msra.mxu0 %v1193_v12 }
  0x18   :  { %1065 = vmatprep.subr.bf16.mxu0 %v1194_v13 }
  0x1b   :  { %1066 = vmatpush3.bf16.msra.mxu0 %v1195_v14 }
  0x1c   :  { %1067 = vmatprep.subr.bf16.mxu0 %v1196_v15 }
  0x1f   :  { %1068 = vmatpush3.bf16.msra.mxu0 %v1197_v16 }
  0x22   :  { %280 = vmatmul.mubr.bf16.vlgmr.msra.gmra.mrb[0].mxu0 %v1198_v17 }
  0x23   :  { %287 = vmatprep.mubr.bf16.mxu0 %v1201_v18 }
  0x2a   :  { %288 = vmatmul.mubr.bf16.gmra.mrb[4].mxu0 %v1203_v19 }
  0x2b   :  { %295 = vmatprep.mubr.bf16.mxu0 %v1204_v20 }
  0x32   :  { %296 = vmatmul.mubr.bf16.gmra.mrb[8].mxu0 %v1206_v21 }
  0x33   :  { %303 = vmatprep.mubr.bf16.mxu0 %v1207_v22 }
  0x3a   :  { %304 = vmatmul.mubr.bf16.gmra.mrb[12].mxu0 %v1209_v23 }
  0x3b   :  { %311 = vmatprep.mubr.bf16.mxu0 %v1210_v24 }
  0x42   :  { %312 = vmatmul.mubr.bf16.gmra.mrb[16].mxu0 %v1212_v25 }
  0x43   :  { %319 = vmatprep.mubr.bf16.mxu0 %v1213_v26 }
  0x4a   :  { %320 = vmatmul.mubr.bf16.gmra.mrb[20].mxu0 %v1215_v27 }
  0x4b   :  { %327 = vmatprep.mubr.bf16.mxu0 %v1216_v28 }
  0x52   :  { %328 = vmatmul.mubr.bf16.gmra.mrb[24].mxu0 %v1218_v29 }
  0x53   :  { %335 = vmatprep.mubr.bf16.mxu0 %v1219_v30 }
  0x5a   :  { %336 = vmatmul.mubr.bf16.gmra.mrb[28].mxu0 %v1221_v32 }
  0x5b   :  { %343 = vmatprep.mubr.bf16.mxu0 %v1004_v33 }
  0x62   :  { %344 = vmatmul.mubr.bf16.gmra.mrb[32].mxu0 %v1003_v34 }
  0xf5   :  { %v1069_v35 = vpop.f32.mrb[0].mxu0 }
  0xf6   :  { %v1070_v36 = vpop.f32.mrb[1].mxu0 }
  0xf7   :  { %v1071_v37 = vadd.f32 %v1070_v36, %v1069_v35  ;;  %v1072_v38 = vpop.f32.mrb[2].mxu0 }
  0xf8   :  { %v1073_v39 = vpop.f32.mrb[3].mxu0 }
  0xf9   :  { %v351_v40 = vmax.f32 %v1071_v37, 0.0  ;;  %v1074_v41 = vadd.f32 %v1073_v39, %v1072_v38  ;;  %v1228_v37 = vld [vmem:[%s1561_s2 + $0x50] sm:$0xff]  }
  0xfa   :  { %v1229_v38 = vld [vmem:[%s1561_s2 + $0x10] sm:$0xff]   ;;  %1127 = vmatprep.subr.bf16.mxu1 %v1228_v37 }
  0xfb   :  { %369 = vst.msk [vmem:[#allocation2] sm:$0xff] %vm368_vm0, %v351_v40  ;;  %v352_v42 = vmax.f32 %v1074_v41, 0.0  ;;  %1128 = vmatpush3.bf16.msra.mxu1 %v1229_v38  ;;  %v1240_v38 = vld [vmem:[%s1561_s2 + $0xc0] sm:$0xff]  }
  0xfd   :  { %370 = vst.msk [vmem:[#allocation2 + $0x8] sm:$0xff] %vm368_vm0, %v352_v42  ;;  %v1075_v43 = vpop.f32.mrb[4].mxu0 }
  0xfe   :  { %v1076_v44 = vpop.f32.mrb[5].mxu0 }
  0xff   :  { %v1077_v45 = vadd.f32 %v1076_v44, %v1075_v43  ;;  %v1078_v46 = vpop.f32.mrb[6].mxu0  ;;  %v1230_v43 = vld [vmem:[%s1561_s2 + $0x58] sm:$0xff]  }
 0x100   :  { %v1079_v47 = vpop.f32.mrb[7].mxu0  ;;  %v1231_v44 = vld [vmem:[%s1561_s2 + $0x18] sm:$0xff]   ;;  %1129 = vmatprep.subr.bf16.mxu1 %v1230_v43 }
 0x101   :  { %v353_v48 = vmax.f32 %v1077_v45, 0.0  ;;  %v1080_v49 = vadd.f32 %v1079_v47, %v1078_v46  ;;  %1130 = vmatpush3.bf16.msra.mxu1 %v1231_v44 }
 0x102   :  { %v386_v51 = vld [vmem:[#allocation2] sm:$0xff] }
 0x103   :  { %371 = vst.msk [vmem:[#allocation2 + $0x10] sm:$0xff] %vm368_vm0, %v353_v48  ;;  %v354_v50 = vmax.f32 %v1080_v49, 0.0 }
 0x104   :  { %v387_v52 = vld [vmem:[#allocation2 + $0x8] sm:$0xff] }
 0x105   :  { %372 = vst.msk [vmem:[#allocation2 + $0x18] sm:$0xff] %vm368_vm0, %v354_v50  ;;  %v1081_v53 = vpop.f32.mrb[8].mxu0  ;;  %v390_v54 = vpack.c.bf16 %v387_v52, %v386_v51  ;;  %v411_v61 = vld [vmem:[#allocation2 + $0x1] sm:$0xff] }
 0x106   :  { %v1082_v55 = vpop.f32.mrb[9].mxu0  ;;  %v501_v10 = vld [vmem:[#allocation2 + $0x4] sm:$0xff] }
 0x107   :  { %v1083_v56 = vadd.f32 %v1082_v55, %v1081_v53  ;;  %v1084_v57 = vpop.f32.mrb[10].mxu0  ;;  %392 = vst.msk [vmem:[#allocation3] sm:$0xff] %vm368_vm0, %v390_v54  ;;  %v1232_v53 = vld [vmem:[%s1561_s2 + $0x60] sm:$0xff]  }
 0x108   :  { %v1085_v58 = vpop.f32.mrb[11].mxu0  ;;  %v1233_v54 = vld [vmem:[%s1561_s2 + $0x20] sm:$0xff]   ;;  %1131 = vmatprep.subr.bf16.mxu1 %v1232_v53 }
 0x109   :  { %v355_v59 = vmax.f32 %v1083_v56, 0.0  ;;  %v1086_v60 = vadd.f32 %v1085_v58, %v1084_v57  ;;  %1132 = vmatpush3.bf16.msra.mxu1 %v1233_v54  ;;  %v525_v54 = vld [vmem:[#allocation2 + $0x5] sm:$0xff] }
 0x10a   :  { %v412_v62 = vld [vmem:[#allocation2 + $0x9] sm:$0xff]  ;;  %1133 = vmatprep.subr.bf16.mxu1 %v1234_v1 }
 0x10b   :  { %373 = vst.msk [vmem:[#allocation2 + $0x20] sm:$0xff] %vm368_vm0, %v355_v59  ;;  %v356_v63 = vmax.f32 %v1086_v60, 0.0  ;;  %v415_v0 = vpack.c.bf16 %v412_v62, %v411_v61  ;;  %v388_v6 = vld [vmem:[#allocation2 + $0x10] sm:$0xff] }
 0x10c   :  { %v389_v12 = vld [vmem:[#allocation2 + $0x18] sm:$0xff]  ;;  %v502_v16 = vld [vmem:[#allocation2 + $0xc] sm:$0xff] }
 0x10d   :  { %374 = vst.msk [vmem:[#allocation2 + $0x28] sm:$0xff] %vm368_vm0, %v356_v63  ;;  %v1087_v2 = vpop.f32.mrb[12].mxu0  ;;  %419 = vrot.lane.b32.xlu1 %v415_v0, %s1256_s24  ;;  %v391_v15 = vpack.c.bf16 %v389_v12, %v388_v6  ;;  %v505_v17 = vpack.c.bf16 %v502_v16, %v501_v10  ;;  %v503_v23 = vld [vmem:[#allocation2 + $0x14] sm:$0xff] }
 0x10e   :  { %v1088_v4 = vpop.f32.mrb[13].mxu0 }
 0x10f   :  { %v1089_v7 = vadd.f32 %v1088_v4, %v1087_v2  ;;  %v1090_v8 = vpop.f32.mrb[14].mxu0  ;;  %393 = vst.msk [vmem:[#allocation3 + $0x20] sm:$0xff] %vm368_vm0, %v391_v15  ;;  %507 = vst.msk [vmem:[#allocation3 + $0x10] sm:$0xff] %vm368_vm0, %v505_v17  ;;  %v1235_v4 = vld [vmem:[%s1561_s2 + $0x28] sm:$0xff]   ;;  %v1237_v15 = vld [vmem:[%s1561_s2 + $0x30] sm:$0xff]  }
 0x110   :  { %v1091_v11 = vpop.f32.mrb[15].mxu0  ;;  %1134 = vmatpush3.bf16.msra.mxu1 %v1235_v4 }
 0x111   :  { %v357_v13 = vmax.f32 %v1089_v7, 0.0  ;;  %v1092_v14 = vadd.f32 %v1091_v11, %v1090_v8 }
 0x112   :  { %v394_v19 = vld [vmem:[#allocation2 + $0x20] sm:$0xff] }
 0x113   :  { %375 = vst.msk [vmem:[#allocation2 + $0x30] sm:$0xff] %vm368_vm0, %v357_v13  ;;  %v358_v18 = vmax.f32 %v1092_v14, 0.0  ;;  %v504_v25 = vld [vmem:[#allocation2 + $0x1c] sm:$0xff]  ;;  %v1236_v14 = vld [vmem:[%s1561_s2 + $0x70] sm:$0xff]  }
 0x114   :  { %v395_v20 = vld [vmem:[#allocation2 + $0x28] sm:$0xff]  ;;  %v506_v28 = vpack.c.bf16 %v504_v25, %v503_v23  ;;  %1135 = vmatprep.subr.bf16.mxu1 %v1236_v14  ;;  %v414_v25 = vld [vmem:[#allocation2 + $0x19] sm:$0xff] }
 0x115   :  { %376 = vst.msk [vmem:[#allocation2 + $0x38] sm:$0xff] %vm368_vm0, %v358_v18  ;;  %v1093_v21 = vpop.f32.mrb[16].mxu0  ;;  %v398_v22 = vpack.c.bf16 %v395_v20, %v394_v19  ;;  %v428_v7 = vld [vmem:[#allocation2 + $0x21] sm:$0xff]  ;;  %1136 = vmatpush3.bf16.msra.mxu1 %v1237_v15 }
 0x116   :  { %v1094_v24 = vpop.f32.mrb[17].mxu0  ;;  %508 = vst.msk [vmem:[#allocation3 + $0x30] sm:$0xff] %vm368_vm0, %v506_v28 }
 0x117   :  { %v1095_v26 = vadd.f32 %v1094_v24, %v1093_v21  ;;  %v1096_v27 = vpop.f32.mrb[18].mxu0  ;;  %402 = vrot.lane.b32.xlu0 %v398_v22, %s1257_s30 }
 0x118   :  { %v1097_v29 = vpop.f32.mrb[19].mxu0 }
 0x119   :  { %v359_v30 = vmax.f32 %v1095_v26, 0.0  ;;  %v1098_v31 = vadd.f32 %v1097_v29, %v1096_v27  ;;  %v1238_v29 = vld [vmem:[%s1561_s2 + $0x78] sm:$0xff]  }
 0x11a   :  { %v429_v0 = vld [vmem:[#allocation2 + $0x29] sm:$0xff]  ;;  %1137 = vmatprep.subr.bf16.mxu1 %v1238_v29 }
 0x11b   :  { %377 = vst.msk [vmem:[#allocation2 + $0x40] sm:$0xff] %vm368_vm0, %v359_v30  ;;  %v360_v32 = vmax.f32 %v1098_v31, 0.0  ;;  %v432_v11 = vpack.c.bf16 %v429_v0, %v428_v7  ;;  %v396_v18 = vld [vmem:[#allocation2 + $0x30] sm:$0xff]  ;;  %v1239_v30 = vld [vmem:[%s1561_s2 + $0x38] sm:$0xff]  }
 0x11c   :  { %v397_v12 = vld [vmem:[#allocation2 + $0x38] sm:$0xff]  ;;  %1138 = vmatpush3.bf16.msra.mxu1 %v1239_v30 }
 0x11d   :  { %378 = vst.msk [vmem:[#allocation2 + $0x48] sm:$0xff] %vm368_vm0, %v360_v32  ;;  %v1099_v33 = vpop.f32.mrb[20].mxu0  ;;  %v399_v21 = vpack.c.bf16 %v397_v12, %v396_v18  ;;  %v413_v32 = vld [vmem:[#allocation2 + $0x11] sm:$0xff]  ;;  %1151 = vmatprep.subr.bf16.mxu1 %v1240_v38 }
 0x11e   :  { %v1100_v34 = vpop.f32.mrb[21].mxu0  ;;  %v543_v14 = vld [vmem:[#allocation2 + $0x35] sm:$0xff] }
 0x11f   :  { %v1101_v35 = vadd.f32 %v1100_v34, %v1099_v33  ;;  %v1102_v36 = vpop.f32.mrb[22].mxu0  ;;  %v416_v34 = vpack.c.bf16 %v414_v25, %v413_v32 }
 0x120   :  { %v1103_v39 = vpop.f32.mrb[23].mxu0 }
 0x121   :  { %v361_v40 = vmax.f32 %v1101_v35, 0.0  ;;  %v1104_v41 = vadd.f32 %v1103_v39, %v1102_v36 }
 0x122   :  { %v445_v46 = vld [vmem:[#allocation2 + $0x40] sm:$0xff] }
 0x123   :  { %379 = vst.msk [vmem:[#allocation2 + $0x50] sm:$0xff] %vm368_vm0, %v361_v40  ;;  %v362_v42 = vmax.f32 %v1104_v41, 0.0  ;;  %v431_v35 = vld [vmem:[#allocation2 + $0x39] sm:$0xff] }
 0x124   :  { %v446_v47 = vld [vmem:[#allocation2 + $0x48] sm:$0xff]  ;;  %v512_v0 = vld [vmem:[#allocation2 + $0x3c] sm:$0xff] }
 0x125   :  { %380 = vst.msk [vmem:[#allocation2 + $0x58] sm:$0xff] %vm368_vm0, %v362_v42  ;;  %v1105_v45 = vpop.f32.mrb[24].mxu0  ;;  %v449_v49 = vpack.c.bf16 %v446_v47, %v445_v46  ;;  %v469_v57 = vld [vmem:[#allocation2 + $0x41] sm:$0xff]  ;;  %v430_v42 = vld [vmem:[#allocation2 + $0x31] sm:$0xff] }
 0x126   :  { %v1106_v48 = vpop.f32.mrb[25].mxu0  ;;  %v557_v59 = vld [vmem:[#allocation2 + $0x44] sm:$0xff]  ;;  %v433_v44 = vpack.c.bf16 %v431_v35, %v430_v42  ;;  %v510_v46 = vld [vmem:[#allocation2 + $0x2c] sm:$0xff] }
 0x127   :  { %v1107_v50 = vadd.f32 %v1106_v48, %v1105_v45  ;;  %v1108_v51 = vpop.f32.mrb[26].mxu0  ;;  %451 = vst.msk [vmem:[#allocation3 + $0x8] sm:$0xff] %vm368_vm0, %v449_v49  ;;  %v509_v48 = vld [vmem:[#allocation2 + $0x24] sm:$0xff] }
 0x128   :  { %v1109_v52 = vpop.f32.mrb[27].mxu0  ;;  %v581_v53 = vld [vmem:[#allocation2 + $0x45] sm:$0xff]  ;;  %v544_v12 = vld [vmem:[#allocation2 + $0x3d] sm:$0xff] }
 0x129   :  { %v363_v55 = vmax.f32 %v1107_v50, 0.0  ;;  %v1110_v56 = vadd.f32 %v1109_v52, %v1108_v51  ;;  %v513_v50 = vpack.c.bf16 %v510_v46, %v509_v48  ;;  %v526_v52 = vld [vmem:[#allocation2 + $0xd] sm:$0xff] }
 0x12a   :  { %v470_v58 = vld [vmem:[#allocation2 + $0x49] sm:$0xff] }
 0x12b   :  { %v558_v60 = vld [vmem:[#allocation2 + $0x4c] sm:$0xff]  ;;  %381 = vst.msk [vmem:[#allocation2 + $0x60] sm:$0xff] %vm368_vm0, %v363_v55  ;;  %v364_v61 = vmax.f32 %v1110_v56, 0.0  ;;  %v473_v62 = vpack.c.bf16 %v470_v58, %v469_v57  ;;  %v529_v56 = vpack.c.bf16 %v526_v52, %v525_v54  ;;  %v1248_v54 = vld [vmem:[%s1561_s2 + $0xe0] sm:$0xff]  }
 0x12c   :  { %v561_v63 = vpack.c.bf16 %v558_v60, %v557_v59  ;;  %v447_v2 = vld [vmem:[#allocation2 + $0x50] sm:$0xff]  ;;  %v448_v5 = vld [vmem:[#allocation2 + $0x58] sm:$0xff]  ;;  %v541_v60 = vld [vmem:[#allocation2 + $0x25] sm:$0xff] }
 0x12d   :  { %382 = vst.msk [vmem:[#allocation2 + $0x68] sm:$0xff] %vm368_vm0, %v364_v61  ;;  %v1111_v3 = vpop.f32.mrb[28].mxu0  ;;  %477 = vrot.lane.b32.xlu1 %v473_v62, %s1256_s24  ;;  %v450_v8 = vpack.c.bf16 %v448_v5, %v447_v2  ;;  %v559_v19 = vld [vmem:[#allocation2 + $0x54] sm:$0xff] }
 0x12e   :  { %563 = vst.msk [vmem:[#allocation3 + $0x18] sm:$0xff] %vm368_vm0, %v561_v63  ;;  %v1112_v6 = vpop.f32.mrb[29].mxu0  ;;  %v471_v47 = vld [vmem:[#allocation2 + $0x51] sm:$0xff] }
 0x12f   :  { %v1113_v9 = vadd.f32 %v1112_v6, %v1111_v3  ;;  %v1114_v10 = vpop.f32.mrb[30].mxu0  ;;  %452 = vst.msk [vmem:[#allocation3 + $0x28] sm:$0xff] %vm368_vm0, %v450_v8  ;;  %v582_v51 = vld [vmem:[#allocation2 + $0x4d] sm:$0xff]  ;;  %v528_v6 = vld [vmem:[#allocation2 + $0x1d] sm:$0xff]  ;;  %v527_v8 = vld [vmem:[#allocation2 + $0x15] sm:$0xff] }
 0x130   :  { %v1115_v13 = vpop.f32.mrb[31].mxu0  ;;  %v585_v55 = vpack.c.bf16 %v582_v51, %v581_v53  ;;  %v542_v58 = vld [vmem:[#allocation2 + $0x2d] sm:$0xff]  ;;  %v583_v18 = vld [vmem:[#allocation2 + $0x55] sm:$0xff] }
 0x131   :  { %v365_v16 = vmax.f32 %v1113_v9, 0.0  ;;  %v1116_v17 = vadd.f32 %v1115_v13, %v1114_v10  ;;  %436 = vrot.lane.b32.xlu1 %v432_v11, %s1258_s23  ;;  %v545_v62 = vpack.c.bf16 %v542_v58, %v541_v60  ;;  %v511_v2 = vld [vmem:[#allocation2 + $0x34] sm:$0xff]  ;;  %v530_v10 = vpack.c.bf16 %v528_v6, %v527_v8  ;;  %v1250_v58 = vld [vmem:[%s1561_s2 + $0xe8] sm:$0xff]  }
 0x132   :  { %v560_v22 = vld [vmem:[#allocation2 + $0x5c] sm:$0xff]  ;;  %v514_v4 = vpack.c.bf16 %v512_v0, %v511_v2  ;;  %v1244_v46 = vld [vmem:[%s1561_s2 + $0xd0] sm:$0xff]  }
 0x133   :  { %383 = vst.msk [vmem:[#allocation2 + $0x70] sm:$0xff] %vm368_vm0, %v365_v16  ;;  %v366_v20 = vmax.f32 %v1116_v17, 0.0  ;;  %v453_v23 = vld [vmem:[#allocation2 + $0x60] sm:$0xff]  ;;  %v562_v26 = vpack.c.bf16 %v560_v22, %v559_v19  ;;  %v546_v16 = vpack.c.bf16 %v544_v12, %v543_v14  ;;  %v1247_v51 = vld [vmem:[%s1561_s2 + $0x98] sm:$0xff]   ;;  %v1253_v0 = vld [vmem:[%s1561_s2 + $0xb0] sm:$0xff]  }
 0x134   :  { %v454_v24 = vld [vmem:[#allocation2 + $0x68] sm:$0xff]  ;;  %v472_v45 = vld [vmem:[#allocation2 + $0x59] sm:$0xff] }
 0x135   :  { %384 = vst.msk [vmem:[#allocation2 + $0x78] sm:$0xff] %vm368_vm0, %v366_v20  ;;  %v1117_v27 = vpop.f32.mrb[32].mxu0  ;;  %404 = vrot.lane.b32.xlu1 %v399_v21, %s1257_s30  ;;  %v457_v28 = vpack.c.bf16 %v454_v24, %v453_v23  ;;  %564 = vst.msk [vmem:[#allocation3 + $0x38] sm:$0xff] %vm368_vm0, %v562_v26  ;;  %v485_v40 = vld [vmem:[#allocation2 + $0x61] sm:$0xff]  ;;  %v474_v49 = vpack.c.bf16 %v472_v45, %v471_v47  ;;  %v1245_v47 = vld [vmem:[%s1561_s2 + $0x90] sm:$0xff]  }
 0x136   :  { %v1118_v31 = vpop.f32.mrb[33].mxu0  ;;  %v565_v59 = vld [vmem:[#allocation2 + $0x64] sm:$0xff] }
 0x137   :  { %v1119_v33 = vadd.f32 %v1118_v31, %v1117_v27  ;;  %461 = vrot.lane.b32.xlu0 %v457_v28, %s1257_s30  ;;  %v1120_v36 = vpop.f32.mrb[34].mxu0  ;;  %v597_v13 = vld [vmem:[#allocation2 + $0x65] sm:$0xff]  ;;  %v584_v17 = vld [vmem:[#allocation2 + $0x5d] sm:$0xff] }
 0x138   :  { %v1121_v37 = vpop.f32.mrb[35].mxu0  ;;  %v586_v19 = vpack.c.bf16 %v584_v17, %v583_v18 }
 0x139   :  { %v367_v39 = vmax.f32 %v1119_v33, 0.0  ;;  %421 = vrot.lane.b32.xlu1 %v416_v34, %s1256_s24  ;;  %v1241_v37 = vld [vmem:[%s1561_s2 + $0x80] sm:$0xff]  }
 0x13a   :  { %v486_v41 = vld [vmem:[#allocation2 + $0x69] sm:$0xff] }
 0x13b   :  { %385 = vst.msk [vmem:[#allocation2 + $0x80] sm:$0xff] %vm368_vm0, %v367_v39  ;;  %v489_v43 = vpack.c.bf16 %v486_v41, %v485_v40  ;;  %v566_v57 = vld [vmem:[#allocation2 + $0x6c] sm:$0xff] }
 0x13c   :  { %v569_v61 = vpack.c.bf16 %v566_v57, %v565_v59  ;;  %v456_v63 = vld [vmem:[#allocation2 + $0x78] sm:$0xff]  ;;  %v455_v1 = vld [vmem:[#allocation2 + $0x70] sm:$0xff]  ;;  %v1242_v41 = vld [vmem:[%s1561_s2 + $0xc8] sm:$0xff]  }
 0x13d   :  { %493 = vrot.lane.b32.xlu0 %v489_v43, %s1258_s23  ;;  %438 = vrot.lane.b32.xlu1 %v433_v44, %s1258_s23  ;;  %v458_v3 = vpack.c.bf16 %v456_v63, %v455_v1  ;;  %v487_v7 = vld [vmem:[#allocation2 + $0x71] sm:$0xff]  ;;  %v1243_v43 = vld [vmem:[%s1561_s2 + $0x88] sm:$0xff]  }
 0x13e   :  { %v598_v11 = vld [vmem:[#allocation2 + $0x6d] sm:$0xff]  ;;  %v599_v24 = vld [vmem:[#allocation2 + $0x75] sm:$0xff] }
 0x13f   :  { %v601_v15 = vpack.c.bf16 %v598_v11, %v597_v13  ;;  %v567_v21 = vld [vmem:[#allocation2 + $0x74] sm:$0xff]  ;;  %v1251_v59 = vld [vmem:[%s1561_s2 + $0xa8] sm:$0xff]  }
 0x141   :  { %479 = vrot.lane.b32.xlu0 %v474_v49, %s1256_s24  ;;  %517 = vrot.lane.b32.xlu1 %v513_v50, %s1257_s30  ;;  %v1246_v50 = vld [vmem:[%s1561_s2 + $0xd8] sm:$0xff]  }
 0x142   :  { %v488_v5 = vld [vmem:[#allocation2 + $0x79] sm:$0xff] }
 0x143   :  { %v490_v9 = vpack.c.bf16 %v488_v5, %v487_v7  ;;  %v568_v20 = vld [vmem:[#allocation2 + $0x7c] sm:$0xff] }
 0x144   :  { %v570_v22 = vpack.c.bf16 %v568_v20, %v567_v21  ;;  %v600_v23 = vld [vmem:[#allocation2 + $0x7d] sm:$0xff] }
 0x145   :  { %589 = vrot.lane.b32.xlu0 %v585_v55, %s1256_s24  ;;  %533 = vrot.lane.b32.xlu1 %v529_v56, %s1256_s24  ;;  %v602_v25 = vpack.c.bf16 %v600_v23, %v599_v24  ;;  %v1249_v55 = vld [vmem:[%s1561_s2 + $0xa0] sm:$0xff]  }
 0x149   :  { %573 = vrot.lane.b32.xlu0 %v569_v61, %s1257_s30  ;;  %549 = vrot.lane.b32.xlu1 %v545_v62, %s1258_s23  ;;  %v1252_v62 = vld [vmem:[%s1561_s2 + $0xf0] sm:$0xff]  }
 0x14d   :  { %463 = vrot.lane.b32.xlu0 %v458_v3, %s1257_s30  ;;  %519 = vrot.lane.b32.xlu1 %v514_v4, %s1257_s30  ;;  %v1254_v3 = vld [vmem:[%s1561_s2 + $0xf8] sm:$0xff]  }
 0x14e   :  { %v1255_v4 = vld [vmem:[%s1561_s2 + $0xb8] sm:$0xff]  }
 0x151   :  { %495 = vrot.lane.b32.xlu0 %v490_v9, %s1258_s23  ;;  %535 = vrot.lane.b32.xlu1 %v530_v10, %s1256_s24 }
 0x155   :  { %605 = vrot.lane.b32.xlu0 %v601_v15, %s1258_s23  ;;  %551 = vrot.lane.b32.xlu1 %v546_v16, %s1258_s23 }
 0x159   :  { %591 = vrot.lane.b32.xlu0 %v586_v19, %s1256_s24 }
 0x15d   :  { %575 = vrot.lane.b32.xlu0 %v570_v22, %s1257_s30 }
 0x161   :  { %607 = vrot.lane.b32.xlu0 %v602_v25, %s1258_s23 }
 0x17f   :  { %v420_v27 = vpop.permute.xlu1 %419 }
 0x189   :  { %v403_v26 = vpop.permute.xlu0 %402 }
 0x18a   :  { %409 = vst.msk [vmem:[#allocation3] sm:$0xff] %vm408_vm1, %v403_v26 }
 0x18b   :  { %426 = vst.msk [vmem:[#allocation3] sm:$0xff] %vm425_vm2, %v420_v27 }
 0x19f   :  { %v478_v28 = vpop.permute.xlu1 %477 }
 0x1a3   :  { %v437_v29 = vpop.permute.xlu1 %436 }
 0x1a4   :  { %443 = vst.msk [vmem:[#allocation3] sm:$0xff] %vm442_vm3, %v437_v29 }
 0x1a7   :  { %v405_v30 = vpop.permute.xlu1 %404 }
 0x1a8   :  { %410 = vst.msk [vmem:[#allocation3 + $0x20] sm:$0xff] %vm408_vm1, %v405_v30 }
 0x1a9   :  { %v462_v31 = vpop.permute.xlu0 %461 }
 0x1aa   :  { %467 = vst.msk [vmem:[#allocation3 + $0x8] sm:$0xff] %vm408_vm1, %v462_v31 }
 0x1ab   :  { %483 = vst.msk [vmem:[#allocation3 + $0x8] sm:$0xff] %vm425_vm2, %v478_v28  ;;  %v422_v32 = vpop.permute.xlu1 %421  ;;  %v613_v42 = vld [vmem:[#allocation3] sm:$0xff] }
 0x1ac   :  { %427 = vst.msk [vmem:[#allocation3 + $0x20] sm:$0xff] %vm425_vm2, %v422_v32 }
 0x1af   :  { %v494_v33 = vpop.permute.xlu0 %493  ;;  %v439_v34 = vpop.permute.xlu1 %438 }
 0x1b0   :  { %499 = vst.msk [vmem:[#allocation3 + $0x8] sm:$0xff] %vm442_vm3, %v494_v33  ;;  %444 = vst.msk [vmem:[#allocation3 + $0x20] sm:$0xff] %vm442_vm3, %v439_v34 }
 0x1b3   :  { %v480_v35 = vpop.permute.xlu0 %479  ;;  %v518_v36 = vpop.permute.xlu1 %517 }
 0x1b4   :  { %523 = vst.msk [vmem:[#allocation3 + $0x10] sm:$0xff] %vm408_vm1, %v518_v36 }
 0x1b7   :  { %v590_v38 = vpop.permute.xlu0 %589  ;;  %v534_v39 = vpop.permute.xlu1 %533  ;;  %v614_v40 = vld [vmem:[#allocation3 + $0x8] sm:$0xff]  ;;  %v617_v63 = vld [vmem:[#allocation3 + $0x20] sm:$0xff] }
 0x1b8   :  { %539 = vst.msk [vmem:[#allocation3 + $0x10] sm:$0xff] %vm425_vm2, %v534_v39  ;;  %909 = vmatprep.mubr.bf16.mxu1 %v614_v40 }
 0x1b9   :  { %910 = vmatmul.mubr.bf16.vlgmr.msra.gmra.mrb[0].mxu1 %v613_v42 }
 0x1ba   :  { %1152 = vmatpush3.bf16.msra.mxu1 %v1241_v37 }
 0x1bb   :  { %v574_v44 = vpop.permute.xlu0 %573  ;;  %v550_v45 = vpop.permute.xlu1 %549  ;;  %1153 = vmatprep.subr.bf16.mxu1 %v1242_v41 }
 0x1bc   :  { %579 = vst.msk [vmem:[#allocation3 + $0x18] sm:$0xff] %vm408_vm1, %v574_v44 }
 0x1bd   :  { %555 = vst.msk [vmem:[#allocation3 + $0x10] sm:$0xff] %vm442_vm3, %v550_v45 }
 0x1be   :  { %595 = vst.msk [vmem:[#allocation3 + $0x18] sm:$0xff] %vm425_vm2, %v590_v38  ;;  %1154 = vmatpush3.bf16.msra.mxu1 %v1243_v43 }
 0x1bf   :  { %v464_v48 = vpop.permute.xlu0 %463  ;;  %v520_v49 = vpop.permute.xlu1 %519  ;;  %1155 = vmatprep.subr.bf16.mxu1 %v1244_v46 }
 0x1c0   :  { %468 = vst.msk [vmem:[#allocation3 + $0x28] sm:$0xff] %vm408_vm1, %v464_v48  ;;  %524 = vst.msk [vmem:[#allocation3 + $0x30] sm:$0xff] %vm408_vm1, %v520_v49 }
 0x1c1   :  { %484 = vst.msk [vmem:[#allocation3 + $0x28] sm:$0xff] %vm425_vm2, %v480_v35 }
 0x1c2   :  { %1156 = vmatpush3.bf16.msra.mxu1 %v1245_v47 }
 0x1c3   :  { %v496_v52 = vpop.permute.xlu0 %495  ;;  %v536_v53 = vpop.permute.xlu1 %535  ;;  %1157 = vmatprep.subr.bf16.mxu1 %v1246_v50 }
 0x1c4   :  { %500 = vst.msk [vmem:[#allocation3 + $0x28] sm:$0xff] %vm442_vm3, %v496_v52  ;;  %v615_v6 = vld [vmem:[#allocation3 + $0x10] sm:$0xff] }
 0x1c5   :  { %540 = vst.msk [vmem:[#allocation3 + $0x30] sm:$0xff] %vm425_vm2, %v536_v53 }
 0x1c6   :  { %1158 = vmatpush3.bf16.msra.mxu1 %v1247_v51 }
 0x1c7   :  { %v606_v56 = vpop.permute.xlu0 %605  ;;  %v552_v57 = vpop.permute.xlu1 %551  ;;  %1159 = vmatprep.subr.bf16.mxu1 %v1248_v54 }
 0x1c8   :  { %611 = vst.msk [vmem:[#allocation3 + $0x18] sm:$0xff] %vm442_vm3, %v606_v56  ;;  %556 = vst.msk [vmem:[#allocation3 + $0x30] sm:$0xff] %vm442_vm3, %v552_v57 }
 0x1ca   :  { %1160 = vmatpush3.bf16.msra.mxu1 %v1249_v55 }
 0x1cb   :  { %v592_v60 = vpop.permute.xlu0 %591  ;;  %v618_v61 = vld [vmem:[#allocation3 + $0x28] sm:$0xff]  ;;  %1161 = vmatprep.subr.bf16.mxu1 %v1250_v58 }
 0x1cc   :  { %917 = vmatprep.mubr.bf16.mxu1 %v618_v61 }
 0x1cd   :  { %918 = vmatmul.mubr.bf16.gmra.mrb[4].mxu1 %v617_v63 }
 0x1ce   :  { %1162 = vmatpush3.bf16.msra.mxu1 %v1251_v59 }
 0x1cf   :  { %v576_v1 = vpop.permute.xlu0 %575  ;;  %1163 = vmatprep.subr.bf16.mxu1 %v1252_v62  ;;  %v616_v2 = vld [vmem:[#allocation3 + $0x18] sm:$0xff]  ;;  %v619_v8 = vld [vmem:[#allocation3 + $0x30] sm:$0xff] }
 0x1d0   :  { %580 = vst.msk [vmem:[#allocation3 + $0x38] sm:$0xff] %vm408_vm1, %v576_v1  ;;  %958 = vmatprep.mubr.bf16.mxu1 %v616_v2 }
 0x1d1   :  { %596 = vst.msk [vmem:[#allocation3 + $0x38] sm:$0xff] %vm425_vm2, %v592_v60 }
 0x1d2   :  { %1164 = vmatpush3.bf16.msra.mxu1 %v1253_v0 }
 0x1d3   :  { %v608_v5 = vpop.permute.xlu0 %607  ;;  %1165 = vmatprep.subr.bf16.mxu1 %v1254_v3 }
 0x1d4   :  { %612 = vst.msk [vmem:[#allocation3 + $0x38] sm:$0xff] %vm442_vm3, %v608_v5 }
 0x1d6   :  { %1166 = vmatpush3.bf16.msra.mxu1 %v1255_v4 }
 0x1d9   :  { %959 = vmatmul.mubr.bf16.vlgmr.msra.gmra.mrb[8].mxu1 %v615_v6 }
 0x1db   :  { %v620_v7 = vld [vmem:[#allocation3 + $0x38] sm:$0xff] }
 0x1dc   :  { %966 = vmatprep.mubr.bf16.mxu1 %v620_v7 }
 0x1e1   :  { %967 = vmatmul.mubr.bf16.gmra.mrb[12].mxu1 %v619_v8 }
 0x28c   :  { %v1139_v9 = vpop.f32.mrb[0].mxu1 }
 0x28d   :  { %v1140_v10 = vpop.f32.mrb[1].mxu1 }
 0x28e   :  { %v1141_v11 = vadd.f32 %v1140_v10, %v1139_v9  ;;  %v1142_v12 = vpop.f32.mrb[2].mxu1 }
 0x28f   :  { %v1143_v13 = vpop.f32.mrb[3].mxu1 }
 0x290   :  { %v1144_v14 = vadd.f32 %v1143_v13, %v1142_v12 }
 0x2a0   :  { %v1145_v15 = vpop.f32.mrb[4].mxu1 }
 0x2a1   :  { %v1146_v16 = vpop.f32.mrb[5].mxu1 }
 0x2a2   :  { %v1147_v17 = vadd.f32 %v1146_v16, %v1145_v15  ;;  %v1148_v18 = vpop.f32.mrb[6].mxu1 }
 0x2a3   :  { %v1149_v19 = vpop.f32.mrb[7].mxu1 }
 0x2a4   :  { %v1150_v20 = vadd.f32 %v1149_v19, %v1148_v18 }
 0x2ac   :  { %v1167_v21 = vpop.f32.mrb[8].mxu1 }
 0x2ad   :  { %v1168_v22 = vpop.f32.mrb[9].mxu1 }
 0x2ae   :  { %v1169_v23 = vadd.f32 %v1168_v22, %v1167_v21  ;;  %v1170_v24 = vpop.f32.mrb[10].mxu1 }
 0x2af   :  { %v1171_v25 = vpop.f32.mrb[11].mxu1 }
 0x2b0   :  { %v961_v26 = vadd.f32 %v1169_v23, %v1141_v11  ;;  %v1172_v27 = vadd.f32 %v1171_v25, %v1170_v24 }
 0x2b2   :  { %v975_v28 = vmax.f32 %v961_v26, 0.0  ;;  %v964_v29 = vadd.f32 %v1172_v27, %v1144_v14 }
 0x2b4   :  { %979 = vst [vmem:[%s1562_s3] sm:$0xff] %v975_v28  ;;  %v976_v30 = vmax.f32 %v964_v29, 0.0  ;;  %v1173_v31 = vpop.f32.mrb[12].mxu1 }
 0x2b5   :  { %v1174_v32 = vpop.f32.mrb[13].mxu1 }
 0x2b6   :  { %980 = vst [vmem:[%s1562_s3 + $0x8] sm:$0xff] %v976_v30  ;;  %v1175_v33 = vadd.f32 %v1174_v32, %v1173_v31  ;;  %v1176_v34 = vpop.f32.mrb[14].mxu1 }
 0x2b7   :  { %v1177_v35 = vpop.f32.mrb[15].mxu1 }
 0x2b8   :  { %v969_v36 = vadd.f32 %v1175_v33, %v1147_v17  ;;  %v1178_v37 = vadd.f32 %v1177_v35, %v1176_v34 }
 0x2ba   :  { %v977_v38 = vmax.f32 %v969_v36, 0.0  ;;  %v972_v39 = vadd.f32 %v1178_v37, %v1150_v20 }
 0x2bc   :  { %981 = vst [vmem:[%s1562_s3 + $0x10] sm:$0xff] %v977_v38  ;;  %v978_v40 = vmax.f32 %v972_v39, 0.0 }
 0x2be   :  { %982 = vst [vmem:[%s1562_s3 + $0x18] sm:$0xff] %v978_v40 }

</bundles_post_ra>
